<compile_context>
chip_gen: v7x
topology: tpu7x:2x2x1
jax: 0.10.0
libtpu: 0.0.40
codegen_flags: <defaults>
</compile_context>

<pallas_src>
import jax
import jax.numpy as jnp
from jax.experimental import pallas as pl
from jax.experimental.pallas import tpu as pltpu

# ---- problem sizes (small, consistent with the module) ----------------------
BS = 2            # batch of episodes
T = 4             # timesteps per episode
N_AGENTS = 8
STATE_DIM = 32
EMBED_DIM = 32
HYPERNET_EMBED = 64

# ---- fused-layout constants --------------------------------------------------
IN_DIM = STATE_DIM + N_AGENTS                  # 40   [state | agent_qs]
H_CAT = 2 * HYPERNET_EMBED + EMBED_DIM         # 160  [h1 | hf | vh]
AQ_B = N_AGENTS * EMBED_DIM                    # 256  agent_qs broadcast lanes
W1_COLS = H_CAT + EMBED_DIM + AQ_B             # 448  [h1|hf|vh | b1 | aq_bcast]
W2_COLS = AQ_B + EMBED_DIM + 1                 # 289  [w1_flat | w_final | v]

MAX_TILE_B = 2048                              # rows per grid step (cap)
VMEM_LIMIT_BYTES = 40 * 1024 * 1024            # above v5e's 16 MiB scoped default


def _round_up(n, m):
    return ((n + m - 1) // m) * m


def _pick_tile_b(b):
    if b <= 256:
        # Tiny batches: single 8-aligned tile.
        return _round_up(max(b, 8), 8)
    # >=2 grid steps so v7x's 2nd TensorCore gets work; large tiles amortize
    # the ~0.35us/step pipeline overhead.  VMEM is not the constraint here.
    return min(MAX_TILE_B, _round_up(pl.cdiv(b, 2), 8))


# ------------------------------ kernel ----------------------------------------
def qmix_kernel(x_ref, w1_ref, b1_ref, w2_ref, b2_ref, out_ref):
    f32 = jnp.float32
    bf16 = jnp.bfloat16
    x = x_ref[...]                                                  # (tb, 40) bf16

    # Fused first stage (one bf16 MXU matmul, f32 accumulation):
    #   lanes [0:160]   = [h1 | hf | vh]  (need ReLU)
    #   lanes [160:192] = b1 = hyper_b_1(state)  (no ReLU)
    #   lanes [192:448] = agent_qs broadcast, 32 lanes per agent
    z1 = jnp.dot(x, w1_ref[...], preferred_element_type=f32) + b1_ref[...]
    h_cat = jnp.maximum(z1[:, 0:H_CAT], 0.0)                        # (tb, 160) f32
    b1 = z1[:, H_CAT:H_CAT + EMBED_DIM]                             # (tb, 32)
    aq_b = z1[:, H_CAT + EMBED_DIM:]                                # (tb, 256)

    # Fused second stage (one block-diagonal bf16 MXU matmul, f32 accumulation):
    #   lanes [0:256]   = hyper_w_1 second layer output (pre-abs)
    #   lanes [256:288] = hyper_w_final second layer output (pre-abs)
    #   lane  [288]     = V second layer output
    z2 = jnp.dot(h_cat.astype(bf16), w2_ref[...],
                 preferred_element_type=f32) + b2_ref[...]
    w1_flat = jnp.abs(z2[:, 0:AQ_B])                                # (tb, 256)
    w_final = jnp.abs(z2[:, AQ_B:AQ_B + EMBED_DIM])                 # (tb, 32)
    v = z2[:, AQ_B + EMBED_DIM:]                                    # (tb, 1)

    # bmm(agent_qs, w1): elementwise multiply then cyclic tree-reduce across the
    # 8 agent segments (32 lanes each).  After the first 128-lane roll the
    # result only needs lanes [0:128], so narrow there (vreg-aligned => free)
    # and do the remaining two rolls on the 128-wide array.
    prod = aq_b * w1_flat                                           # (tb, 256)
    r = prod + pltpu.roll(prod, shift=4 * EMBED_DIM, axis=1)        # (tb, 256)
    r = r[:, 0:4 * EMBED_DIM]                                       # (tb, 128)
    r = r + pltpu.roll(r, shift=2 * EMBED_DIM, axis=1)
    r = r + pltpu.roll(r, shift=EMBED_DIM, axis=1)
    hid_pre = r[:, 0:EMBED_DIM] + b1                                # (tb, 32)

    # TODO(synk): training-mode dropout (p=0.2) not implemented (eval = identity).
    hid = jnp.where(hid_pre > 0, hid_pre,
                    jnp.exp(jnp.minimum(hid_pre, 0.0)) - 1.0)       # ELU, alpha=1

    y = jnp.sum(hid * w_final, axis=-1, keepdims=True) + v          # (tb, 1)
    out_ref[...] = y.astype(out_ref.dtype)


# ------------------------------ wrapper ----------------------------------------
def qmixer_forward(agent_qs, states, packed, *, tile_b=None):
    """agent_qs: (bs, T, n_agents); states: (bs, T, state_dim) -> q_tot (bs, T, 1)."""
    bs, t = agent_qs.shape[0], agent_qs.shape[1]
    aq = agent_qs.reshape(-1, N_AGENTS).astype(jnp.float32)
    st = states.reshape(-1, STATE_DIM).astype(jnp.float32)
    b = aq.shape[0]

    # bf16 MXU operands; accumulation stays f32 inside the kernel.
    x = jnp.concatenate([st, aq], axis=1).astype(jnp.bfloat16)      # (b, 40)

    if tile_b is None:
        tile_b = _pick_tile_b(b)
    padded = _round_up(b, tile_b)
    if padded != b:
        x = jnp.pad(x, ((0, padded - b), (0, 0)))

    w1c, b1c, w2c, b2c = packed

    grid = (padded // tile_b,)
    cost = pl.CostEstimate(
        flops=2 * padded * (IN_DIM * W1_COLS + H_CAT * W2_COLS),
        transcendentals=padded * EMBED_DIM,
        bytes_accessed=(2 * padded * IN_DIM + 4 * padded
                        + 2 * (w1c.size + w2c.size)
                        + 4 * (b1c.size + b2c.size)),
    )

    out = pl.pallas_call(
        qmix_kernel,
        out_shape=jax.ShapeDtypeStruct((padded, 1), jnp.float32),
        grid_spec=pltpu.PrefetchScalarGridSpec(
            num_scalar_prefetch=0,
            grid=grid,
            in_specs=[
                pl.BlockSpec((tile_b, IN_DIM), lambda i: (i, 0)),     # activations
                pl.BlockSpec((IN_DIM, W1_COLS), lambda i: (0, 0)),    # resident weights
                pl.BlockSpec((1, W1_COLS), lambda i: (0, 0)),
                pl.BlockSpec((H_CAT, W2_COLS), lambda i: (0, 0)),
                pl.BlockSpec((1, W2_COLS), lambda i: (0, 0)),
            ],
            out_specs=pl.BlockSpec((tile_b, 1), lambda i: (i, 0)),
        ),
        compiler_params=pltpu.CompilerParams(
            dimension_semantics=("parallel",),        # shards steps across v7x's 2 TCs
            vmem_limit_bytes=VMEM_LIMIT_BYTES,
        ),
        cost_estimate=cost,
    )(x, w1c, b1c, w2c, b2c)

    return out[:b].reshape(bs, t, 1)


# ------------------------------ params -----------------------------------------
def init_params(key):
    """Deterministic PyTorch-Linear-style init (uniform +-1/sqrt(fan_in))."""
    ks = jax.random.split(key, 16)

    def lin(kw, kb, fan_in, fan_out):
        bound = 1.0 / jnp.sqrt(jnp.float32(fan_in))
        w = jax.random.uniform(kw, (fan_in, fan_out), jnp.float32, -bound, bound)
        bias = jax.random.uniform(kb, (1, fan_out), jnp.float32, -bound, bound)
        return w, bias

    p = {}
    p["w1a"], p["b1a"] = lin(ks[0], ks[1], STATE_DIM, HYPERNET_EMBED)
    p["w1b"], p["b1b"] = lin(ks[2], ks[3], HYPERNET_EMBED, EMBED_DIM * N_AGENTS)
    p["wfa"], p["bfa"] = lin(ks[4], ks[5], STATE_DIM, HYPERNET_EMBED)
    p["wfb"], p["bfb"] = lin(ks[6], ks[7], HYPERNET_EMBED, EMBED_DIM)
    p["hbw"], p["hbb"] = lin(ks[8], ks[9], STATE_DIM, EMBED_DIM)
    p["v1w"], p["v1b"] = lin(ks[10], ks[11], STATE_DIM, EMBED_DIM)
    p["v2w"], p["v2b"] = lin(ks[12], ks[13], EMBED_DIM, 1)
    return p


def pack_params(p):
    """One-time packing of the 16 Linear params into 4 fused kernel operands.

    Fused weights are stored in bf16 (MXU-native); biases stay f32 (added after
    the f32-accumulating matmul).
    """
    h = HYPERNET_EMBED
    # First-stage fused weight (40, 448): columns [h1 | hf | vh | b1 | aq_bcast].
    w1c = jnp.zeros((IN_DIM, W1_COLS), jnp.float32)
    w1c = w1c.at[0:STATE_DIM, 0:h].set(p["w1a"])
    w1c = w1c.at[0:STATE_DIM, h:2 * h].set(p["wfa"])
    w1c = w1c.at[0:STATE_DIM, 2 * h:2 * h + EMBED_DIM].set(p["v1w"])
    w1c = w1c.at[0:STATE_DIM, H_CAT:H_CAT + EMBED_DIM].set(p["hbw"])
    # Expansion matrix: agent a -> lanes [32a, 32a+32) of the aq_bcast segment
    # (0/1 entries, exact in bf16).
    expand = (jnp.arange(AQ_B)[None, :] // EMBED_DIM
              == jnp.arange(N_AGENTS)[:, None]).astype(jnp.float32)   # (8, 256)
    w1c = w1c.at[STATE_DIM:IN_DIM, H_CAT + EMBED_DIM:].set(expand)
    b1c = jnp.concatenate(
        [p["b1a"], p["bfa"], p["v1b"], p["hbb"], jnp.zeros((1, AQ_B), jnp.float32)],
        axis=1)                                                       # (1, 448) f32

    # Second-stage block-diagonal weight (160, 289): [w1_flat | w_final | v].
    w2c = jnp.zeros((H_CAT, W2_COLS), jnp.float32)
    w2c = w2c.at[0:h, 0:AQ_B].set(p["w1b"])
    w2c = w2c.at[h:2 * h, AQ_B:AQ_B + EMBED_DIM].set(p["wfb"])
    w2c = w2c.at[2 * h:H_CAT, AQ_B + EMBED_DIM:].set(p["v2w"])
    b2c = jnp.concatenate([p["b1b"], p["bfb"], p["v2b"]], axis=1)     # (1, 289) f32

    return (w1c.astype(jnp.bfloat16), b1c, w2c.astype(jnp.bfloat16), b2c)


# ------------------------------ reference --------------------------------------
def reference_forward(agent_qs, states, p):
    """Pure-JAX f32 reference mirroring the PyTorch forward (dropout in eval mode)."""
    bs = agent_qs.shape[0]
    st = states.reshape(-1, STATE_DIM)
    aq = agent_qs.reshape(-1, 1, N_AGENTS)
    h1 = jax.nn.relu(st @ p["w1a"] + p["b1a"])
    w1 = jnp.abs(h1 @ p["w1b"] + p["b1b"]).reshape(-1, N_AGENTS, EMBED_DIM)
    b1 = (st @ p["hbw"] + p["hbb"]).reshape(-1, 1, EMBED_DIM)
    hidden = jax.nn.elu(jnp.einsum("bij,bjk->bik", aq, w1) + b1)
    hf = jax.nn.relu(st @ p["wfa"] + p["bfa"])
    wf = jnp.abs(hf @ p["wfb"] + p["bfb"]).reshape(-1, EMBED_DIM, 1)
    v = (jax.nn.relu(st @ p["v1w"] + p["v1b"]) @ p["v2w"] + p["v2b"]).reshape(-1, 1, 1)
    y = jnp.einsum("bij,bjk->bik", hidden, wf) + v
    return y.reshape(bs, -1, 1)


if __name__ == "__main__":
    key = jax.random.PRNGKey(0)
    k_p, k_q, k_s = jax.random.split(key, 3)
    params = init_params(k_p)
    packed = pack_params(params)

    # bf16 MXU operands => ~1% relative accuracy vs. the f32 reference.
    ATOL, RTOL = 3e-2, 3e-2

    # Small demo shape (bs=2, T=4): single-tile path.
    agent_qs = jax.random.normal(k_q, (BS, T, N_AGENTS), jnp.float32)
    states = jax.random.normal(k_s, (BS, T, STATE_DIM), jnp.float32)
    q_tot = jax.block_until_ready(qmixer_forward(agent_qs, states, packed))
    q_ref = reference_forward(agent_qs, states, params)
    assert q_tot.shape == (BS, T, 1)
    assert jnp.allclose(q_tot, q_ref, atol=ATOL, rtol=RTOL), \
        float(jnp.max(jnp.abs(q_tot - q_ref)))

    # Larger batch exercising the multi-tile (>=2 grid steps) + padding path.
    k_q2, k_s2 = jax.random.split(jax.random.PRNGKey(1), 2)
    bs2, t2 = 5, 101                                  # b=505 -> tile_b=256, grid=(2,)
    aq2 = jax.random.normal(k_q2, (bs2, t2, N_AGENTS), jnp.float32)
    st2 = jax.random.normal(k_s2, (bs2, t2, STATE_DIM), jnp.float32)
    q2 = jax.block_until_ready(qmixer_forward(aq2, st2, packed))
    q2_ref = reference_forward(aq2, st2, params)
    assert q2.shape == (bs2, t2, 1)
    assert jnp.allclose(q2, q2_ref, atol=ATOL, rtol=RTOL), \
        float(jnp.max(jnp.abs(q2 - q2_ref)))

    print("KERNEL_OK")
</pallas_src>

<mosaic_0001>
module attributes {stable_mosaic.version = 11 : i64} {
  func.func @qmix_kernel(%arg0: i32, %arg1: memref<8x40xbf16, #tpu.memory_space<vmem>>, %arg2: memref<40x448xbf16, #tpu.memory_space<vmem>>, %arg3: memref<1x448xf32, #tpu.memory_space<vmem>>, %arg4: memref<160x289xbf16, #tpu.memory_space<vmem>>, %arg5: memref<1x289xf32, #tpu.memory_space<vmem>>, %arg6: memref<8x1xf32, #tpu.memory_space<vmem>>) attributes {dimension_semantics = [#tpu.dimension_semantics<parallel>], iteration_bounds = array<i64: 1>, scalar_prefetch = 0 : i64, scratch_operands = 0 : i64, tpu.core_type = #tpu.core_type<tc>, window_params = [{transform_indices = @transform_0, window_bounds = array<i64: 8, 40>}, {pipeline_mode = #tpu.pipeline_mode<synchronous>, transform_indices = @transform_1, window_bounds = array<i64: 40, 448>}, {pipeline_mode = #tpu.pipeline_mode<synchronous>, transform_indices = @transform_2, window_bounds = array<i64: 1, 448>}, {pipeline_mode = #tpu.pipeline_mode<synchronous>, transform_indices = @transform_3, window_bounds = array<i64: 160, 289>}, {pipeline_mode = #tpu.pipeline_mode<synchronous>, transform_indices = @transform_4, window_bounds = array<i64: 1, 289>}, {transform_indices = @transform_5, window_bounds = array<i64: 8, 1>}]} {
    %c0 = arith.constant 0 : index
    %c0_0 = arith.constant 0 : index
    %0 = vector.load %arg1[%c0, %c0_0] : memref<8x40xbf16, #tpu.memory_space<vmem>>, vector<8x40xbf16>
    %c0_1 = arith.constant 0 : index
    %c0_2 = arith.constant 0 : index
    %1 = vector.load %arg2[%c0_1, %c0_2] : memref<40x448xbf16, #tpu.memory_space<vmem>>, vector<40x448xbf16>
    %cst = arith.constant dense<0.000000e+00> : vector<8x448xf32>
    %2 = tpu.matmul %0, %1, %cst {dimension_numbers = #tpu.dot_dimension_numbers<[1], [0], [0], [1], [0, 0, 1, 1], [], []>} : vector<8x40xbf16>, vector<40x448xbf16>, vector<8x448xf32> -> vector<8x448xf32>
    %c0_3 = arith.constant 0 : index
    %c0_4 = arith.constant 0 : index
    %3 = vector.load %arg3[%c0_3, %c0_4] : memref<1x448xf32, #tpu.memory_space<vmem>>, vector<1x448xf32>
    %4 = vector.broadcast %3 : vector<1x448xf32> to vector<8x448xf32>
    %5 = arith.addf %2, %4 : vector<8x448xf32>
    %6 = vector.extract_strided_slice %5 {offsets = [0, 0], sizes = [8, 160], strides = [1, 1]} : vector<8x448xf32> to vector<8x160xf32>
    %cst_5 = arith.constant 0.000000e+00 : f32
    %7 = vector.broadcast %cst_5 : f32 to vector<8x160xf32>
    %8 = arith.maximumf %6, %7 : vector<8x160xf32>
    %9 = vector.extract_strided_slice %5 {offsets = [0, 160], sizes = [8, 32], strides = [1, 1]} : vector<8x448xf32> to vector<8x32xf32>
    %10 = vector.extract_strided_slice %5 {offsets = [0, 192], sizes = [8, 256], strides = [1, 1]} : vector<8x448xf32> to vector<8x256xf32>
    %11 = arith.truncf %8 : vector<8x160xf32> to vector<8x160xbf16>
    %c0_6 = arith.constant 0 : index
    %c0_7 = arith.constant 0 : index
    %12 = vector.load %arg4[%c0_6, %c0_7] : memref<160x289xbf16, #tpu.memory_space<vmem>>, vector<160x289xbf16>
    %cst_8 = arith.constant dense<0.000000e+00> : vector<8x289xf32>
    %13 = tpu.matmul %11, %12, %cst_8 {dimension_numbers = #tpu.dot_dimension_numbers<[1], [0], [0], [1], [0, 0, 1, 1], [], []>} : vector<8x160xbf16>, vector<160x289xbf16>, vector<8x289xf32> -> vector<8x289xf32>
    %c0_9 = arith.constant 0 : index
    %c0_10 = arith.constant 0 : index
    %14 = vector.load %arg5[%c0_9, %c0_10] : memref<1x289xf32, #tpu.memory_space<vmem>>, vector<1x289xf32>
    %15 = vector.broadcast %14 : vector<1x289xf32> to vector<8x289xf32>
    %16 = arith.addf %13, %15 : vector<8x289xf32>
    %17 = vector.extract_strided_slice %16 {offsets = [0, 0], sizes = [8, 256], strides = [1, 1]} : vector<8x289xf32> to vector<8x256xf32>
    %18 = math.absf %17 : vector<8x256xf32>
    %19 = vector.extract_strided_slice %16 {offsets = [0, 256], sizes = [8, 32], strides = [1, 1]} : vector<8x289xf32> to vector<8x32xf32>
    %20 = math.absf %19 : vector<8x32xf32>
    %21 = vector.extract_strided_slice %16 {offsets = [0, 288], sizes = [8, 1], strides = [1, 1]} : vector<8x289xf32> to vector<8x1xf32>
    %22 = arith.mulf %10, %18 : vector<8x256xf32>
    %c128_i32 = arith.constant 128 : i32
    %23 = tpu.dynamic_rotate %22 by %c128_i32 dim 1 : vector<8x256xf32>, i32 -> vector<8x256xf32>
    %24 = arith.addf %22, %23 : vector<8x256xf32>
    %25 = vector.extract_strided_slice %24 {offsets = [0, 0], sizes = [8, 128], strides = [1, 1]} : vector<8x256xf32> to vector<8x128xf32>
    %c64_i32 = arith.constant 64 : i32
    %26 = tpu.dynamic_rotate %25 by %c64_i32 dim 1 : vector<8x128xf32>, i32 -> vector<8x128xf32>
    %27 = arith.addf %25, %26 : vector<8x128xf32>
    %c32_i32 = arith.constant 32 : i32
    %28 = tpu.dynamic_rotate %27 by %c32_i32 dim 1 : vector<8x128xf32>, i32 -> vector<8x128xf32>
    %29 = arith.addf %27, %28 : vector<8x128xf32>
    %30 = vector.extract_strided_slice %29 {offsets = [0, 0], sizes = [8, 32], strides = [1, 1]} : vector<8x128xf32> to vector<8x32xf32>
    %31 = arith.addf %30, %9 : vector<8x32xf32>
    %cst_11 = arith.constant 0.000000e+00 : f32
    %32 = vector.broadcast %cst_11 : f32 to vector<8x32xf32>
    %33 = arith.cmpf ogt, %31, %32 : vector<8x32xf32>
    %cst_12 = arith.constant 0.000000e+00 : f32
    %34 = vector.broadcast %cst_12 : f32 to vector<8x32xf32>
    %35 = arith.minimumf %31, %34 : vector<8x32xf32>
    %36 = math.exp %35 : vector<8x32xf32>
    %cst_13 = arith.constant 1.000000e+00 : f32
    %37 = vector.broadcast %cst_13 : f32 to vector<8x32xf32>
    %38 = arith.subf %36, %37 : vector<8x32xf32>
    %39 = arith.select %33, %31, %38 : vector<8x32xi1>, vector<8x32xf32>
    %40 = arith.mulf %39, %20 : vector<8x32xf32>
    %cst_14 = arith.constant dense<0.000000e+00> : vector<8xf32>
    %41 = vector.multi_reduction <add>, %40, %cst_14 [1] : vector<8x32xf32> to vector<8xf32>
    %42 = vector.shape_cast %41 : vector<8xf32> to vector<8x1xf32>
    %43 = arith.addf %42, %21 : vector<8x1xf32>
    %c0_15 = arith.constant 0 : index
    %c0_16 = arith.constant 0 : index
    %44 = vector.load %arg6[%c0_15, %c0_16] : memref<8x1xf32, #tpu.memory_space<vmem>>, vector<8x1xf32>
    tpu.vector_store %arg6[%c0_15, %c0_16], %43 {strides = array<i32>} : memref<8x1xf32, #tpu.memory_space<vmem>>, vector<8x1xf32>,
    return
  }
  func.func @transform_0(%arg0: i32) -> (i32, i32) {
    %c0_i32 = arith.constant 0 : i32
    %c0_i32_0 = arith.constant 0 : i32
    return %arg0, %c0_i32 : i32, i32
  }
  func.func @transform_1(%arg0: i32) -> (i32, i32) {
    %c0_i32 = arith.constant 0 : i32
    %c0_i32_0 = arith.constant 0 : i32
    %c0_i32_1 = arith.constant 0 : i32
    return %c0_i32, %c0_i32_0 : i32, i32
  }
  func.func @transform_2(%arg0: i32) -> (i32, i32) {
    %c0_i32 = arith.constant 0 : i32
    %c0_i32_0 = arith.constant 0 : i32
    %c0_i32_1 = arith.constant 0 : i32
    return %c0_i32, %c0_i32_0 : i32, i32
  }
  func.func @transform_3(%arg0: i32) -> (i32, i32) {
    %c0_i32 = arith.constant 0 : i32
    %c0_i32_0 = arith.constant 0 : i32
    %c0_i32_1 = arith.constant 0 : i32
    return %c0_i32, %c0_i32_0 : i32, i32
  }
  func.func @transform_4(%arg0: i32) -> (i32, i32) {
    %c0_i32 = arith.constant 0 : i32
    %c0_i32_0 = arith.constant 0 : i32
    %c0_i32_1 = arith.constant 0 : i32
    return %c0_i32, %c0_i32_0 : i32, i32
  }
  func.func @transform_5(%arg0: i32) -> (i32, i32) {
    %c0_i32 = arith.constant 0 : i32
    %c0_i32_0 = arith.constant 0 : i32
    return %arg0, %c0_i32 : i32, i32
  }
}

</mosaic_0001>

<bundles_post_ra>
// kernel: tpu_custom_call.1
= control target key start
LH: loop header
LB: loop body
LE: loop exit
PB: predicated region body
PF: predicated region fallthrough
CT: control target
= control target key end

     0   :  { %10 = vsyncpa [#allocation3], 0  ;;  %s983_s0 = inlined_call_operand.hbm [shape: bf16[8,40], index: 0, kind: input, shape index: {}]   ;;  %s984_s1 = inlined_call_operand.hbm [shape: bf16[40,448], index: 1, kind: input, shape index: {}]   ;;  %s985_s2 = inlined_call_operand.vmem [shape: f32[1,448], index: 2, kind: input, shape index: {}]   ;;  %s986_s3 = inlined_call_operand.hbm [shape: bf16[160,289], index: 3, kind: input, shape index: {}]   ;;  %s987_s4 = inlined_call_operand.vmem [shape: f32[1,289], index: 4, kind: input, shape index: {}]   ;;  %s988_s5 = inlined_call_operand.vmem [shape: f32[8,1], index: 5, kind: output, shape index: {}]  }
   0x1   :  { %11 = vsyncpa [#allocation5], 0  ;;  %s840_s18 = smov [#allocation4]   ;;  %s770_s22 = scalar_lea.hbm %s984_s1, 1280 }
   0x2   :  { %s27_s19 = sshll.u32 %s840_s18, 4  ;;  %p771_p0 = scmp.ne.s32.totalorder %s984_s1, %s770_s22  ;;  %s28_s19 = int_to_ptr.vmem [resolvable:$true] %s27_s19 }
   0x3   :  { %p774_p1 = scmp.lt.u32.totalorder %s770_s22, %s984_s1 }
   0x5   :  { %p776_p2 = pnand %p774_p1, %p771_p0 }
   0x7   :  { %779 = shalt.err (!%p776_p2)
}
   0x8   :  { %s780_s27 = scalar_lea.vmem %s28_s19, 1280  ;;  %p785_p4 = scmp.lt.s32.totalorder %s28_s19, %s28_s19 }
   0x9   :  { %p781_p3 = scmp.ne.s32.totalorder %s28_s19, %s780_s27  ;;  %p786_p5 = scmp.lt.s32.totalorder %s780_s27, %s780_s27 }
   0xb   :  { %p787_p6 = por %p786_p5, %p785_p4 }
   0xd   :  { %p788_p7 = pnand %p787_p6, %p781_p3 }
   0xf   :  { %791 = shalt.err (!%p788_p7)
}
  0x10   :  { %s841_s28 = smov 256   ;;  %s842_s29 = smov 16  }
  0x11   :  { %33 = dma.hbm_to_vmem [thread:$0]  %s984_s1, 1280, %s28_s19, [#allocation5], %s841_s28, %s841_s28, %s842_s29  }
  0x12   :  { %s843_s7 = smov [#allocation2]   ;;  %s844_s9 = smov [#allocation6]  }
  0x13   :  { %s18_s8 = sshll.u32 %s843_s7, 4  ;;  %s41_s10 = sshll.u32 %s844_s9, 4  ;;  %s19_s8 = int_to_ptr.vmem [resolvable:$true] %s18_s8  ;;  %s42_s10 = int_to_ptr.vmem [resolvable:$true] %s41_s10 }
  0x14   :  { %s792_s13 = scalar_lea.hbm %s983_s0, 64 }
  0x15   :  { %p793_p8 = scmp.ne.s32.totalorder %s983_s0, %s792_s13  ;;  %p796_p9 = scmp.lt.u32.totalorder %s792_s13, %s983_s0 }
  0x17   :  { %p798_p10 = pnand %p796_p9, %p793_p8 }
  0x19   :  { %801 = shalt.err (!%p798_p10)
}
  0x1a   :  { %s802_s1 = scalar_lea.vmem %s19_s8, 64  ;;  %p807_p12 = scmp.lt.s32.totalorder %s19_s8, %s19_s8 }
  0x1b   :  { %p803_p11 = scmp.ne.s32.totalorder %s19_s8, %s802_s1  ;;  %p808_p13 = scmp.lt.s32.totalorder %s802_s1, %s802_s1 }
  0x1d   :  { %p809_p0 = por %p808_p13, %p807_p12 }
  0x1f   :  { %p810_p1 = pnand %p809_p0, %p803_p11 }
  0x21   :  { %813 = shalt.err (!%p810_p1)
}
  0x22   :  { %21 = dma.hbm_to_vmem [thread:$0]  %s983_s0, 64, %s19_s8, [#allocation3]  }
  0x23   :  { %s814_s22 = scalar_lea.hbm %s986_s3, 3840 }
  0x24   :  { %p815_p2 = scmp.ne.s32.totalorder %s986_s3, %s814_s22  ;;  %p818_p3 = scmp.lt.u32.totalorder %s814_s22, %s986_s3 }
  0x26   :  { %p820_p4 = pnand %p818_p3, %p815_p2 }
  0x28   :  { %823 = shalt.err (!%p820_p4)
}
  0x29   :  { %s824_s27 = scalar_lea.vmem %s42_s10, 3840  ;;  %p829_p6 = scmp.lt.s32.totalorder %s42_s10, %s42_s10 }
  0x2a   :  { %p825_p5 = scmp.ne.s32.totalorder %s42_s10, %s824_s27  ;;  %p830_p7 = scmp.lt.s32.totalorder %s824_s27, %s824_s27 }
  0x2c   :  { %p831_p8 = por %p830_p7, %p829_p6 }
  0x2e   :  { %p832_p9 = pnand %p831_p8, %p825_p5 }
  0x30   :  { %835 = shalt.err (!%p832_p9)
}
  0x31   :  { %s845_s0 = smov 192   ;;  %s846_s28 = smov 12  }
  0x32   :  { %47 = dma.hbm_to_vmem [thread:$0]  %s986_s3, 3840, %s42_s10, [#allocation5], %s845_s0, %s845_s0, %s846_s28  }
  0x33   :  { %836 = dma.done.wait [#allocation3], 64  }
  0x34   :  { %837 = vsyncadd [#allocation3], 4294967232 }
  0x35   :  { %838 = dma.done.wait [#allocation5], 5120  }
  0x36   :  { %839 = vsyncadd [#allocation5], 4294962176  ;;  %v847_v0 = vmov 0   ;;  %v712_v1 = vld [vmem:[#allocation4 + $0x4] ss:$16 sps:$4 sm:$0xff]   ;;  %vm147_vm0 = vcmask 1043456   ;;  %v73_v48 = vlaneseq }
  0x37   :  { %192 = vmatprep.mubr.bf16.mxu0 %v847_v0  ;;  %233 = vmatprep.mubr.bf16.mxu1 %v847_v0  ;;  %v714_v2 = vld [vmem:[#allocation4] ss:$16 sps:$4 sm:$0xff]   ;;  %v715_v3 = vld [vmem:[#allocation4 + $0x24] ss:$16 sps:$4 sm:$0xff]   ;;  %v720_v8 = vld [vmem:[#allocation4 + $0xc] ss:$16 sps:$4 sm:$0xff]  }
  0x38   :  { %160 = vmatprep.subr.bf16.mxu0 %v712_v1  ;;  %v69_v4 = vld [vmem:[#allocation4 + $0x40] sm:$0xff]  ;;  %v722_v9 = vld [vmem:[#allocation4 + $0x8] ss:$16 sps:$4 sm:$0xff]   ;;  %v723_v10 = vld [vmem:[#allocation4 + $0x2c] ss:$16 sps:$4 sm:$0xff]   ;;  %201 = vmatprep.subr.bf16.mxu1 %v720_v8  ;;  %vm143_vm1 = vcmask 326656  }
  0x39   :  { %161 = vmatpush1.bf16.msra.mxu0 %v714_v2  ;;  %v717_v5 = vld [vmem:[#allocation4 + $0x20] ss:$16 sps:$4 sm:$0xff]   ;;  %v661_v6 = vcombine.high %v69_v4, %v69_v4  ;;  %v660_v7 = vcombine.low %v69_v4, %v69_v4  ;;  %v70_v11 = vld [vmem:[#allocation4 + $0x48] sm:$0xff]  ;;  %202 = vmatpush1.bf16.msra.mxu1 %v722_v9  ;;  %v60_v17 = vld [vmem:[#allocation2] sm:$0xf]  ;;  %v933_v49 = vshrl.u32 %v73_v48, 7 }
  0x3a   :  { %162 = vmatprep.subr.bf16.mxu0 %v715_v3  ;;  %v725_v12 = vld [vmem:[#allocation4 + $0x28] ss:$16 sps:$4 sm:$0xff]   ;;  %v662_v13 = vcombine.low %v70_v11, %v70_v11  ;;  %203 = vmatprep.subr.bf16.mxu1 %v723_v10  ;;  %v663_v15 = vcombine.high %v70_v11, %v70_v11  ;;  %v730_v16 = vld [vmem:[#allocation6 + $0x4] ss:$12 sps:$4 sm:$0xff]   ;;  %v728_v19 = vld [vmem:[#allocation6] ss:$12 sps:$4 sm:$0xff]  }
  0x3b   :  { %v149_v14 = vsel %vm147_vm0, %v660_v7, 0  ;;  %v734_v20 = vld [vmem:[#allocation6 + $0x1c] ss:$12 sps:$4 sm:$0xff]   ;;  %v732_v22 = vld [vmem:[#allocation6 + $0x18] ss:$12 sps:$4 sm:$0xff]   ;;  %v75_v50 = vsub.s32 0, %v933_v49 }
  0x3c   :  { %v155_v18 = vsel %vm147_vm0, %v662_v13, 0  ;;  %v731_v21 = vld [vmem:[#allocation6 + $0x8] ss:$12 sps:$4 sm:$0xff]   ;;  %v735_v24 = vld [vmem:[#allocation6 + $0x20] ss:$12 sps:$4 sm:$0xff]   ;;  %v79_v52 = vsub.s32 1, %v933_v49 }
  0x3d   :  { %163 = vmatpush1.bf16.msra.mxu0 %v717_v5  ;;  %204 = vmatpush1.bf16.msra.mxu1 %v725_v12  ;;  %v738_v23 = vld [vmem:[#allocation6 + $0x34] ss:$12 sps:$4 sm:$0xff]   ;;  %v736_v25 = vld [vmem:[#allocation6 + $0x30] ss:$12 sps:$4 sm:$0xff]   ;;  %v742_v26 = vld [vmem:[#allocation6 + $0x4c] ss:$12 sps:$4 sm:$0xff]  }
  0x3e   :  { %664 = vmatprep.subr.msk.bf16.mxu0 %vm147_vm0, %v661_v6  ;;  %666 = vmatprep.subr.msk.bf16.mxu1 %vm147_vm0, %v663_v15  ;;  %v739_v27 = vld [vmem:[#allocation6 + $0x38] ss:$12 sps:$4 sm:$0xff]   ;;  %v740_v28 = vld [vmem:[#allocation6 + $0x48] ss:$12 sps:$4 sm:$0xff]   ;;  %v743_v30 = vld [vmem:[#allocation6 + $0x50] ss:$12 sps:$4 sm:$0xff]  }
  0x3f   :  { %v746_v29 = vld [vmem:[#allocation6 + $0x64] ss:$12 sps:$4 sm:$0xff]   ;;  %v744_v31 = vld [vmem:[#allocation6 + $0x60] ss:$12 sps:$4 sm:$0xff]   ;;  %v750_v32 = vld [vmem:[#allocation6 + $0x7c] ss:$12 sps:$4 sm:$0xff]  }
  0x40   :  { %v747_v33 = vld [vmem:[#allocation6 + $0x68] ss:$12 sps:$4 sm:$0xff]   ;;  %v748_v34 = vld [vmem:[#allocation6 + $0x78] ss:$12 sps:$4 sm:$0xff]   ;;  %v751_v36 = vld [vmem:[#allocation6 + $0x80] ss:$12 sps:$4 sm:$0xff]  }
  0x41   :  { %165 = vmatpush1.bf16.msra.mxu0 %v149_v14  ;;  %206 = vmatpush1.bf16.msra.mxu1 %v155_v18  ;;  %v754_v35 = vld [vmem:[#allocation6 + $0x94] ss:$12 sps:$4 sm:$0xff]   ;;  %v752_v37 = vld [vmem:[#allocation6 + $0x90] ss:$12 sps:$4 sm:$0xff]   ;;  %v758_v38 = vld [vmem:[#allocation6 + $0xac] ss:$12 sps:$4 sm:$0xff]  }
  0x42   :  { %467 = vmatprep.subr.bf16.mxu0 %v730_v16  ;;  %508 = vmatprep.subr.bf16.mxu1 %v847_v0  ;;  %v755_v39 = vld [vmem:[#allocation6 + $0x98] ss:$12 sps:$4 sm:$0xff]   ;;  %v756_v40 = vld [vmem:[#allocation6 + $0xa8] ss:$12 sps:$4 sm:$0xff]   ;;  %v759_v41 = vld [vmem:[#allocation6 + $0xb0] ss:$12 sps:$4 sm:$0xff]  }
  0x43   :  { %v762_v42 = vld [vmem:[#allocation6 + $0xc4] ss:$12 sps:$4 sm:$0xff]   ;;  %v760_v43 = vld [vmem:[#allocation6 + $0xc0] ss:$12 sps:$4 sm:$0xff]   ;;  %v763_v44 = vld [vmem:[#allocation6 + $0xc8] ss:$12 sps:$4 sm:$0xff]  }
  0x44   :  { %665 = vmatmul.mubr.msk.bf16.vlgmr.msra.gmra.mrb[0].mxu0 %vm143_vm1, %v60_v17  ;;  %667 = vmatmul.mubr.msk.bf16.vlgmr.msra.gmra.mrb[0].mxu1 %vm143_vm1, %v60_v17  ;;  %v766_v45 = vld [vmem:[#allocation6 + $0xdc] ss:$12 sps:$4 sm:$0xff]   ;;  %v764_v46 = vld [vmem:[#allocation6 + $0xd8] ss:$12 sps:$4 sm:$0xff]   ;;  %v767_v47 = vld [vmem:[#allocation6 + $0xe0] ss:$12 sps:$4 sm:$0xff]  }
  0x45   :  { %468 = vmatpush1.bf16.msra.mxu0 %v728_v19  ;;  %509 = vmatpush1.bf16.msra.mxu1 %v731_v21  ;;  %v71_v51 = vld [vmem:[%s985_s2] sm:$0xf]  ;;  %vm463_vm2 = vcmask 261120   ;;  %s848_s8 = smov 64   ;;  %v83_v21 = vsub.s32 2, %v933_v49  ;;  %vm557_vm3 = vcmask 523264  }
  0x46   :  { %469 = vmatprep.subr.bf16.mxu0 %v734_v20  ;;  %510 = vmatprep.subr.bf16.mxu1 %v847_v0  ;;  %v76_v53 = vrot.slane %v71_v51, %v75_v50  ;;  %v80_v54 = vrot.slane %v71_v51, %v79_v52  ;;  %v948_v5 = vld [vmem:[%s987_s4] sm:$0x7]  ;;  %v87_v20 = vsub.s32 3, %v933_v49  ;;  %s849_s4 = smov 32   ;;  %s850_s9 = smov 96   ;;  %vm644_vm5 = vcmask 7168  }
  0x47   :  { %v291_v6 = vrot.slane %v948_v5, %v75_v50  ;;  %v295_v7 = vrot.slane %v948_v5, %v79_v52  ;;  %v299_v52 = vrot.slane %v948_v5, %v83_v21 }
  0x49   :  { %470 = vmatpush1.bf16.msra.mxu0 %v732_v22  ;;  %511 = vmatpush1.bf16.msra.mxu1 %v735_v24  ;;  %v88_v22 = vrot.slane %v71_v51, %v87_v20 }
  0x4a   :  { %471 = vmatprep.subr.bf16.mxu0 %v738_v23  ;;  %512 = vmatprep.subr.bf16.mxu1 %v847_v0  ;;  %v84_v23 = vrot.slane %v71_v51, %v83_v21 }
  0x4d   :  { %472 = vmatpush1.bf16.msra.mxu0 %v736_v25  ;;  %513 = vmatpush1.bf16.msra.mxu1 %v739_v27 }
  0x4e   :  { %473 = vmatprep.subr.bf16.mxu0 %v742_v26  ;;  %514 = vmatprep.subr.bf16.mxu1 %v847_v0 }
  0x51   :  { %474 = vmatpush1.bf16.msra.mxu0 %v740_v28  ;;  %515 = vmatpush1.bf16.msra.mxu1 %v743_v30 }
  0x52   :  { %475 = vmatprep.subr.bf16.mxu0 %v746_v29  ;;  %516 = vmatprep.subr.bf16.mxu1 %v847_v0 }
  0x55   :  { %476 = vmatpush1.bf16.msra.mxu0 %v744_v31  ;;  %517 = vmatpush1.bf16.msra.mxu1 %v747_v33 }
  0x56   :  { %477 = vmatprep.subr.bf16.mxu0 %v750_v32  ;;  %518 = vmatprep.subr.bf16.mxu1 %v847_v0 }
  0x59   :  { %478 = vmatpush1.bf16.msra.mxu0 %v748_v34  ;;  %519 = vmatpush1.bf16.msra.mxu1 %v751_v36 }
  0x5a   :  { %479 = vmatprep.subr.bf16.mxu0 %v754_v35  ;;  %520 = vmatprep.subr.bf16.mxu1 %v847_v0 }
  0x5d   :  { %480 = vmatpush1.bf16.msra.mxu0 %v752_v37  ;;  %521 = vmatpush1.bf16.msra.mxu1 %v755_v39 }
  0x5e   :  { %481 = vmatprep.subr.bf16.mxu0 %v758_v38  ;;  %522 = vmatprep.subr.bf16.mxu1 %v847_v0 }
  0x61   :  { %482 = vmatpush1.bf16.msra.mxu0 %v756_v40  ;;  %523 = vmatpush1.bf16.msra.mxu1 %v759_v41 }
  0x62   :  { %524 = vmatprep.subr.bf16.mxu1 %v847_v0  ;;  %483 = vmatprep.subr.bf16.mxu0 %v762_v42 }
  0x65   :  { %484 = vmatpush1.bf16.msra.mxu0 %v760_v43  ;;  %525 = vmatpush1.bf16.msra.mxu1 %v763_v44 }
  0x66   :  { %526 = vmatprep.subr.bf16.mxu1 %v847_v0  ;;  %485 = vmatprep.subr.bf16.mxu0 %v766_v45 }
  0x69   :  { %486 = vmatpush1.bf16.msra.mxu0 %v764_v46  ;;  %527 = vmatpush1.bf16.msra.mxu1 %v767_v47 }
 0x117   :  { %v194_v55 = vpop.f32.mrb[0].mxu0  ;;  %v235_v63 = vpop.f32.mrb[0].mxu1 }
 0x118   :  { %v195_v56 = vadd.f32 %v194_v55, %v76_v53  ;;  %v196_v57 = vpop.f32.mrb[1].mxu0  ;;  %v237_v0 = vpop.f32.mrb[1].mxu1  ;;  %v236_v27 = vadd.f32 %v235_v63, %v84_v23 }
 0x119   :  { %v940_v58 = vadd.f32 %v196_v57, %v80_v54  ;;  %v198_v59 = vpop.f32.mrb[2].mxu0  ;;  %v239_v2 = vpop.f32.mrb[2].mxu1  ;;  %v238_v25 = vadd.f32 %v237_v0, %v88_v22 }
 0x11a   :  { %v242_v60 = vmax.f32 %v195_v56, 0.0  ;;  %v199_v61 = vpop.f32.mrb[3].mxu0  ;;  %v240_v4 = vpop.f32.mrb[3].mxu1 }
 0x11b   :  { %v243_v62 = vmax.f32 %v940_v58, 0.0 }
 0x11c   :  { %v244_v3 = vpack.c.bf16 %v242_v60, %v242_v60 }
 0x11d   :  { %v245_v1 = vpack.c.bf16 %v243_v62, %v243_v62 }
 0x11f   :  { %698 = vmatprep.mubr.msk.bf16.mxu0 %vm463_vm2, %v245_v1  ;;  %699 = vmatprep.mubr.msk.bf16.mxu1 %vm463_vm2, %v245_v1 }
 0x120   :  { %500 = vmatmul.mubr.bf16.vlgmr.msra.gmra.mrb[4].mxu0 %v244_v3  ;;  %541 = vmatmul.mubr.bf16.vlgmr.msra.gmra.mrb[4].mxu1 %v244_v3 }
 0x1f3   :  { %v501_v8 = vpop.f32.mrb[4].mxu0  ;;  %v542_v9 = vpop.f32.mrb[4].mxu1 }
 0x1f4   :  { %v502_v10 = vadd.f32 %v501_v8, %v291_v6  ;;  %v503_v11 = vpop.f32.mrb[5].mxu0  ;;  %v544_v12 = vpop.f32.mrb[5].mxu1  ;;  %v543_v53 = vadd.f32 %v542_v9, %v299_v52 }
 0x1f5   :  { %v505_v13 = vpop.f32.mrb[6].mxu0  ;;  %v545_v14 = vpop.f32.mrb[6].mxu1  ;;  %v504_v16 = vadd.f32 %v503_v11, %v295_v7 }
 0x1f6   :  { %v548_v15 = vand.u32 2147483647, %v502_v10  ;;  %v506_v17 = vpop.f32.mrb[7].mxu0  ;;  %v546_v18 = vpop.f32.mrb[7].mxu1  ;;  %v550_v55 = vand.u32 2147483647, %v543_v53 }
 0x1f7   :  { %v549_v19 = vand.u32 2147483647, %v504_v16 }
 0x1f8   :  { %553 = vrot.lane.b32.xlu0 %v548_v15, %s848_s8 }
 0x1fc   :  { %555 = vrot.lane.b32.xlu0 %v549_v19, %s848_s8 }
 0x26a   :  { %v554_v24 = vpop.permute.xlu0 %553 }
 0x26b   :  { %v562_v26 = vmul.f32 %v554_v24, %v940_v58 }
 0x26d   :  { %568 = vrot.lane.b32.xlu1 %v562_v26, %s848_s8 }
 0x26e   :  { %v556_v28 = vpop.permute.xlu0 %555 }
 0x26f   :  { %v558_v29 = vsel %vm557_vm3, %v554_v24, %v556_v28  ;;  %v564_v30 = vmul.f32 %v556_v28, %v238_v25 }
 0x270   :  { %v563_v31 = vmul.f32 %v558_v29, %v236_v27 }
 0x271   :  { %572 = vrot.lane.b32.xlu0 %v564_v30, %s848_s8 }
 0x272   :  { %570 = vrot.lane.b32.xlu1 %v563_v31, %s848_s8 }
 0x2df   :  { %v569_v32 = vpop.permute.xlu1 %568 }
 0x2e3   :  { %v573_v33 = vpop.permute.xlu0 %572 }
 0x2e4   :  { %v571_v34 = vpop.permute.xlu1 %570 }
 0x2e5   :  { %v575_v35 = vsel %vm557_vm3, %v571_v34, %v573_v33  ;;  %v574_v36 = vsel %vm557_vm3, %v569_v32, %v571_v34 }
 0x2e6   :  { %576 = vrot.lane.b32.xlu1 %v575_v35, %s848_s8  ;;  %578 = vrot.lane.b32.xlu0 %v574_v36, %s848_s8 }
 0x358   :  { %v577_v37 = vpop.permute.xlu1 %576  ;;  %v579_v38 = vpop.permute.xlu0 %578 }
 0x359   :  { %v583_v39 = vadd.f32 %v577_v37, %v562_v26  ;;  %v580_v40 = vsel %vm557_vm3, %v577_v37, %v579_v38 }
 0x35a   :  { %v584_v41 = vadd.f32 %v580_v40, %v563_v31 }
 0x35b   :  { %587 = vrot.lane.b32.xlu1 %v583_v39, %s848_s8 }
 0x35c   :  { %589 = vrot.lane.b32.xlu0 %v584_v41, %s848_s8 }
 0x3cd   :  { %v588_v42 = vpop.permute.xlu1 %587 }
 0x3ce   :  { %v590_v43 = vpop.permute.xlu0 %589 }
 0x3cf   :  { %v591_v44 = vsel %vm557_vm3, %v588_v42, %v590_v43 }
 0x3d0   :  { %593 = vrot.lane.b32.xlu1 %v591_v44, %s848_s8 }
 0x442   :  { %v594_v45 = vpop.permute.xlu1 %593 }
 0x443   :  { %596 = vrot.lane.b32.xlu0 %v594_v45, %s848_s8 }
 0x4b5   :  { %v597_v46 = vpop.permute.xlu0 %596 }
 0x4b6   :  { %v599_v47 = vadd.f32 %v597_v46, %v583_v39  ;;  %v600_v48 = vadd.f32 %v597_v46, %v584_v41 }
 0x4b8   :  { %605 = vrot.lane.b32.xlu0 %v600_v48, %s848_s8  ;;  %603 = vrot.lane.b32.xlu1 %v599_v47, %s848_s8 }
 0x52a   :  { %v606_v49 = vpop.permute.xlu0 %605  ;;  %v604_v50 = vpop.permute.xlu1 %603 }
 0x52b   :  { %v607_v51 = vsel %vm557_vm3, %v604_v50, %v606_v49 }
 0x52c   :  { %609 = vrot.lane.b32.xlu1 %v607_v51, %s849_s4 }
 0x530   :  { %617 = vrot.lane.b32.xlu1 %v940_v58, %s849_s4 }
 0x59e   :  { %v610_v54 = vpop.permute.xlu1 %609 }
 0x59f   :  { %612 = vrot.lane.b32.xlu0 %v610_v54, %s848_s8 }
 0x5a2   :  { %v618_v59 = vpop.permute.xlu1 %617 }
 0x5a3   :  { %628 = vrot.lane.b32.xlu0 %v550_v55, %s848_s8 }
 0x611   :  { %v613_v56 = vpop.permute.xlu0 %612 }
 0x612   :  { %v615_v57 = vadd.f32 %v613_v56, %v599_v47 }
 0x614   :  { %v620_v60 = vadd.f32 %v618_v59, %v615_v57 }
 0x615   :  { %v629_v1 = vpop.permute.xlu0 %628 }
 0x616   :  { %v622_v61 = vmin.f32 %v620_v60, 0.0  ;;  %vm621_vm4 = vcmp.gt.f32.partialorder %v620_v60, 0.0 }
 0x618   :  { %v623_v62 = vmul.f32 1.442695, %v622_v61 }
 0x61a   :  { %768 = vpow2.f32 %v623_v62 }
 0x624   :  { %v769_v63 = vpop.eup %768 }
 0x625   :  { %v700_v0 = vadd.f32 -1.0, %v769_v63 }
 0x627   :  { %v626_v58 = vsel %vm621_vm4, %v620_v60, %v700_v0 }
 0x628   :  { %v631_v2 = vmul.f32 %v629_v1, %v626_v58 }
 0x62a   :  { %633 = vrot.lane.b32.xlu1 %v631_v2, %s848_s8 }
 0x69c   :  { %v634_v3 = vpop.permute.xlu1 %633 }
 0x69d   :  { %v636_v4 = vsel %vm463_vm2, %v634_v3, 0.0 }
 0x69e   :  { %637 = vadd.xlane.f32.xlu0 %v636_v4 }
 0x72b   :  { %v638_v5 = vpop.xlane.xlu0 %637 }
 0x72c   :  { %v639_v6 = vadd.f32 %v638_v5, %v543_v53 }
 0x72e   :  { %641 = vrot.lane.b32.xlu1 %v639_v6, %s850_s9 }
 0x7a0   :  { %v642_v7 = vpop.permute.xlu1 %641 }
 0x7a1   :  { %645 = vst.msk [vmem:[%s988_s5] sm:$0xff] %vm644_vm5, %v642_v7 }
 0x7a2   :  { %650 = vsyncpa [#allocation3], 1 }
 0x7a3   :  { %651 = vsyncpa [#allocation5], 1 }

</bundles_post_ra>
